<compile_context>
chip_gen: v7x
topology: tpu7x:2x2x1
jax: 0.10.0
libtpu: 0.0.40
codegen_flags: <defaults>
</compile_context>

<pallas_src>
import jax
import jax.numpy as jnp
from jax.experimental import pallas as pl
from jax.experimental.pallas import tpu as pltpu

# ---- static configuration (shapes implied by the module __init__) ----------
INPUT_DIM = 2      # (x, y) coordinates for the PDE domain
HIDDEN_DIM = 32
OUTPUT_DIM = 1
DEPTH = 3          # number of hidden Linear layers

# domain bounds / boundary condition (stand-ins for `domain_bounds` / `b_c`)
XMIN, XMAX = 0.0, 1.0
YMIN, YMAX = 0.0, 1.0
BC_VALUE = 0.5     # constant Dirichlet boundary value returned by bvf


# ---- Pallas kernel ----------------------------------------------------------
def adf_mlp_kernel(zT_ref, w1x_ref, w1y_ref, b1_ref, hwT_ref, hb_ref,
                   wo_ref, bo_ref, out_ref):
    # lane-dense rows of coordinates: (1, tile_n)
    x = zT_ref[0:1, :]
    y = zT_ref[1:2, :]

    # fc1 (in_features = 2): VPU FMAs, no MXU.  No activation after it
    # (matches the PyTorch forward exactly).  (H,1) columns broadcast along
    # lanes against (1,T) coordinate rows -> (H,T).
    h = w1x_ref[...] * x + w1y_ref[...] * y + b1_ref[...]        # (H, T) f32

    # hidden stack: 32x32 matmuls on the MXU (bf16 in, f32 acc) + tanh (EUP).
    for d in range(DEPTH):                                       # static unroll
        h = jnp.dot(hwT_ref[d], h.astype(jnp.bfloat16),
                    preferred_element_type=jnp.float32) + hb_ref[d]
        h = jnp.tanh(h)

    # output layer (32 -> 1): VPU multiply + sublane (XLU) reduction, no MXU.
    nn_out = jnp.sum(wo_ref[...] * h, axis=0, keepdims=True) + bo_ref[...]

    # approximate distance function (zero on the unit-square boundary);
    # all lane-dense VPU work fused into the epilogue.
    phi = (x - XMIN) * (XMAX - x) * (y - YMIN) * (YMAX - y)      # (1, T)

    out_ref[...] = phi * nn_out + BC_VALUE


# ---- wrapper ---------------------------------------------------------------
def adf_mlp_forward(z, w1, b1, hw, hb, wo, bo, *, tile_n=1024):
    n = z.shape[0]
    n_pad = pl.cdiv(n, tile_n) * tile_n
    grid = (n_pad // tile_n,)

    # batch -> lane axis; pad the batch to a multiple of the tile.
    zT = jnp.zeros((INPUT_DIM, n_pad), jnp.float32).at[:, :n].set(z.T)

    # skinny weight columns / biases as (H, 1) columns; broadcast happens
    # in-kernel (free lane splat), keeping HBM traffic and VMEM footprint low.
    w1x_c = w1[0, :].reshape(HIDDEN_DIM, 1).astype(jnp.float32)
    w1y_c = w1[1, :].reshape(HIDDEN_DIM, 1).astype(jnp.float32)
    b1_c = b1.reshape(HIDDEN_DIM, 1).astype(jnp.float32)
    hb_c = jnp.transpose(hb, (0, 2, 1)).astype(jnp.float32)       # (D, H, 1)
    wo_c = wo.reshape(HIDDEN_DIM, 1).astype(jnp.float32)
    bo_c = bo.reshape(1, 1).astype(jnp.float32)

    # hidden weights transposed for the (out, in) @ (in, lanes) layout; bf16
    # operands for the MXU, accumulation stays f32 inside the kernel.
    hwT = jnp.transpose(hw, (0, 2, 1)).astype(jnp.bfloat16)       # (D, H, H)

    const2 = lambda i: (0, 0)
    const3 = lambda i: (0, 0, 0)

    out_T = pl.pallas_call(
        adf_mlp_kernel,
        out_shape=jax.ShapeDtypeStruct((OUTPUT_DIM, n_pad), jnp.float32),
        grid=grid,
        in_specs=[
            pl.BlockSpec((INPUT_DIM, tile_n), lambda i: (0, i)),      # zT
            pl.BlockSpec((HIDDEN_DIM, 1), const2),                    # w1x_c
            pl.BlockSpec((HIDDEN_DIM, 1), const2),                    # w1y_c
            pl.BlockSpec((HIDDEN_DIM, 1), const2),                    # b1_c
            pl.BlockSpec((DEPTH, HIDDEN_DIM, HIDDEN_DIM), const3),    # hwT
            pl.BlockSpec((DEPTH, HIDDEN_DIM, 1), const3),             # hb_c
            pl.BlockSpec((HIDDEN_DIM, 1), const2),                    # wo_c
            pl.BlockSpec((1, 1), const2),                             # bo_c
        ],
        out_specs=pl.BlockSpec((OUTPUT_DIM, tile_n), lambda i: (0, i)),
        compiler_params=pltpu.CompilerParams(
            dimension_semantics=("parallel",),
            vmem_limit_bytes=32 * 1024 * 1024),
    )(zT, w1x_c, w1y_c, b1_c, hwT, hb_c, wo_c, bo_c)

    # back to the module's (N, output_dim) layout, dropping the pad.
    return out_T[:, :n].T


# ---- pure-JAX reference (mirrors the PyTorch forward, full f32) -------------
def reference_forward(z, w1, b1, hw, hb, wo, bo):
    z1 = z @ w1 + b1
    for d in range(DEPTH):
        z1 = jnp.tanh(z1 @ hw[d] + hb[d])
    nn_out = z1 @ wo + bo
    x, y = z[:, 0:1], z[:, 1:2]
    phi = (x - XMIN) * (XMAX - x) * (y - YMIN) * (YMAX - y)
    return phi * nn_out + BC_VALUE


# ---- deterministic parameter init -------------------------------------------
def init_params(key):
    ks = jax.random.split(key, 6)

    def uni(k, shape, fan_in):
        bound = 1.0 / jnp.sqrt(fan_in)
        return jax.random.uniform(k, shape, jnp.float32, -bound, bound)

    w1 = uni(ks[0], (INPUT_DIM, HIDDEN_DIM), INPUT_DIM)
    b1 = uni(ks[1], (1, HIDDEN_DIM), INPUT_DIM)
    hw = uni(ks[2], (DEPTH, HIDDEN_DIM, HIDDEN_DIM), HIDDEN_DIM)
    hb = uni(ks[3], (DEPTH, 1, HIDDEN_DIM), HIDDEN_DIM)
    wo = uni(ks[4], (HIDDEN_DIM, OUTPUT_DIM), HIDDEN_DIM)
    bo = uni(ks[5], (1, OUTPUT_DIM), HIDDEN_DIM)
    return w1, b1, hw, hb, wo, bo


if __name__ == "__main__":
    key = jax.random.PRNGKey(0)
    k_z, k_p = jax.random.split(key)

    # collocation points in the unit square (small demo; a few grid steps
    # including one padded tile).
    N = 300
    z = jax.random.uniform(k_z, (N, INPUT_DIM), jnp.float32, 0.0, 1.0)
    params = init_params(k_p)

    out = adf_mlp_forward(z, *params, tile_n=128)
    out = jax.block_until_ready(out)

    ref = reference_forward(z, *params)
    assert out.shape == (N, OUTPUT_DIM)
    max_err = float(jnp.max(jnp.abs(out - ref)))
    # tolerance relaxed for bf16 MXU inputs (f32 accumulation, tanh-bounded net)
    assert max_err < 2e-2, f"max abs err = {max_err}"

    print("KERNEL_OK")
</pallas_src>

<mosaic_0001>
module attributes {stable_mosaic.version = 11 : i64} {
  func.func @adf_mlp_kernel(%arg0: i32, %arg1: memref<2x128xf32, #tpu.memory_space<vmem>>, %arg2: memref<32x1xf32, #tpu.memory_space<vmem>>, %arg3: memref<32x1xf32, #tpu.memory_space<vmem>>, %arg4: memref<32x1xf32, #tpu.memory_space<vmem>>, %arg5: memref<3x32x32xbf16, #tpu.memory_space<vmem>>, %arg6: memref<3x32x1xf32, #tpu.memory_space<vmem>>, %arg7: memref<32x1xf32, #tpu.memory_space<vmem>>, %arg8: memref<1x1xf32, #tpu.memory_space<vmem>>, %arg9: memref<1x128xf32, #tpu.memory_space<vmem>>) attributes {dimension_semantics = [#tpu.dimension_semantics<parallel>], iteration_bounds = array<i64: 3>, scalar_prefetch = 0 : i64, scratch_operands = 0 : i64, tpu.core_type = #tpu.core_type<tc>, window_params = [{transform_indices = @transform_0, window_bounds = array<i64: 2, 128>}, {pipeline_mode = #tpu.pipeline_mode<synchronous>, transform_indices = @transform_1, window_bounds = array<i64: 32, 1>}, {pipeline_mode = #tpu.pipeline_mode<synchronous>, transform_indices = @transform_2, window_bounds = array<i64: 32, 1>}, {pipeline_mode = #tpu.pipeline_mode<synchronous>, transform_indices = @transform_3, window_bounds = array<i64: 32, 1>}, {pipeline_mode = #tpu.pipeline_mode<synchronous>, transform_indices = @transform_4, window_bounds = array<i64: 3, 32, 32>}, {pipeline_mode = #tpu.pipeline_mode<synchronous>, transform_indices = @transform_5, window_bounds = array<i64: 3, 32, 1>}, {pipeline_mode = #tpu.pipeline_mode<synchronous>, transform_indices = @transform_6, window_bounds = array<i64: 32, 1>}, {pipeline_mode = #tpu.pipeline_mode<synchronous>, transform_indices = @transform_7, window_bounds = array<i64: 1, 1>}, {transform_indices = @transform_8, window_bounds = array<i64: 1, 128>}]} {
    %c0 = arith.constant 0 : index
    %c0_0 = arith.constant 0 : index
    %0 = vector.load %arg1[%c0, %c0_0] : memref<2x128xf32, #tpu.memory_space<vmem>>, vector<1x128xf32>
    %c1 = arith.constant 1 : index
    %c0_1 = arith.constant 0 : index
    %1 = vector.load %arg1[%c1, %c0_1] : memref<2x128xf32, #tpu.memory_space<vmem>>, vector<1x128xf32>
    %c0_2 = arith.constant 0 : index
    %c0_3 = arith.constant 0 : index
    %2 = vector.load %arg2[%c0_2, %c0_3] : memref<32x1xf32, #tpu.memory_space<vmem>>, vector<32x1xf32>
    %3 = vector.broadcast %2 : vector<32x1xf32> to vector<32x128xf32>
    %4 = vector.broadcast %0 : vector<1x128xf32> to vector<32x128xf32>
    %5 = arith.mulf %3, %4 : vector<32x128xf32>
    %c0_4 = arith.constant 0 : index
    %c0_5 = arith.constant 0 : index
    %6 = vector.load %arg3[%c0_4, %c0_5] : memref<32x1xf32, #tpu.memory_space<vmem>>, vector<32x1xf32>
    %7 = vector.broadcast %6 : vector<32x1xf32> to vector<32x128xf32>
    %8 = vector.broadcast %1 : vector<1x128xf32> to vector<32x128xf32>
    %9 = arith.mulf %7, %8 : vector<32x128xf32>
    %10 = arith.addf %5, %9 : vector<32x128xf32>
    %c0_6 = arith.constant 0 : index
    %c0_7 = arith.constant 0 : index
    %11 = vector.load %arg4[%c0_6, %c0_7] : memref<32x1xf32, #tpu.memory_space<vmem>>, vector<32x1xf32>
    %12 = vector.broadcast %11 : vector<32x1xf32> to vector<32x128xf32>
    %13 = arith.addf %10, %12 : vector<32x128xf32>
    %c0_8 = arith.constant 0 : index
    %c0_9 = arith.constant 0 : index
    %c0_10 = arith.constant 0 : index
    %14 = vector.load %arg5[%c0_8, %c0_9, %c0_10] : memref<3x32x32xbf16, #tpu.memory_space<vmem>>, vector<1x32x32xbf16>
    %15 = vector.shape_cast %14 : vector<1x32x32xbf16> to vector<32x32xbf16>
    %16 = arith.truncf %13 : vector<32x128xf32> to vector<32x128xbf16>
    %cst = arith.constant dense<0.000000e+00> : vector<32x128xf32>
    %17 = tpu.matmul %15, %16, %cst {dimension_numbers = #tpu.dot_dimension_numbers<[1], [0], [0], [1], [0, 0, 1, 1], [], []>} : vector<32x32xbf16>, vector<32x128xbf16>, vector<32x128xf32> -> vector<32x128xf32>
    %c0_11 = arith.constant 0 : index
    %c0_12 = arith.constant 0 : index
    %c0_13 = arith.constant 0 : index
    %18 = vector.load %arg6[%c0_11, %c0_12, %c0_13] : memref<3x32x1xf32, #tpu.memory_space<vmem>>, vector<1x32x1xf32>
    %19 = vector.shape_cast %18 : vector<1x32x1xf32> to vector<32x1xf32>
    %20 = vector.broadcast %19 : vector<32x1xf32> to vector<32x128xf32>
    %21 = arith.addf %17, %20 : vector<32x128xf32>
    %22 = math.tanh %21 : vector<32x128xf32>
    %c1_14 = arith.constant 1 : index
    %c0_15 = arith.constant 0 : index
    %c0_16 = arith.constant 0 : index
    %23 = vector.load %arg5[%c1_14, %c0_15, %c0_16] : memref<3x32x32xbf16, #tpu.memory_space<vmem>>, vector<1x32x32xbf16>
    %24 = vector.shape_cast %23 : vector<1x32x32xbf16> to vector<32x32xbf16>
    %25 = arith.truncf %22 : vector<32x128xf32> to vector<32x128xbf16>
    %cst_17 = arith.constant dense<0.000000e+00> : vector<32x128xf32>
    %26 = tpu.matmul %24, %25, %cst_17 {dimension_numbers = #tpu.dot_dimension_numbers<[1], [0], [0], [1], [0, 0, 1, 1], [], []>} : vector<32x32xbf16>, vector<32x128xbf16>, vector<32x128xf32> -> vector<32x128xf32>
    %c1_18 = arith.constant 1 : index
    %c0_19 = arith.constant 0 : index
    %c0_20 = arith.constant 0 : index
    %27 = vector.load %arg6[%c1_18, %c0_19, %c0_20] : memref<3x32x1xf32, #tpu.memory_space<vmem>>, vector<1x32x1xf32>
    %28 = vector.shape_cast %27 : vector<1x32x1xf32> to vector<32x1xf32>
    %29 = vector.broadcast %28 : vector<32x1xf32> to vector<32x128xf32>
    %30 = arith.addf %26, %29 : vector<32x128xf32>
    %31 = math.tanh %30 : vector<32x128xf32>
    %c2 = arith.constant 2 : index
    %c0_21 = arith.constant 0 : index
    %c0_22 = arith.constant 0 : index
    %32 = vector.load %arg5[%c2, %c0_21, %c0_22] : memref<3x32x32xbf16, #tpu.memory_space<vmem>>, vector<1x32x32xbf16>
    %33 = vector.shape_cast %32 : vector<1x32x32xbf16> to vector<32x32xbf16>
    %34 = arith.truncf %31 : vector<32x128xf32> to vector<32x128xbf16>
    %cst_23 = arith.constant dense<0.000000e+00> : vector<32x128xf32>
    %35 = tpu.matmul %33, %34, %cst_23 {dimension_numbers = #tpu.dot_dimension_numbers<[1], [0], [0], [1], [0, 0, 1, 1], [], []>} : vector<32x32xbf16>, vector<32x128xbf16>, vector<32x128xf32> -> vector<32x128xf32>
    %c2_24 = arith.constant 2 : index
    %c0_25 = arith.constant 0 : index
    %c0_26 = arith.constant 0 : index
    %36 = vector.load %arg6[%c2_24, %c0_25, %c0_26] : memref<3x32x1xf32, #tpu.memory_space<vmem>>, vector<1x32x1xf32>
    %37 = vector.shape_cast %36 : vector<1x32x1xf32> to vector<32x1xf32>
    %38 = vector.broadcast %37 : vector<32x1xf32> to vector<32x128xf32>
    %39 = arith.addf %35, %38 : vector<32x128xf32>
    %40 = math.tanh %39 : vector<32x128xf32>
    %c0_27 = arith.constant 0 : index
    %c0_28 = arith.constant 0 : index
    %41 = vector.load %arg7[%c0_27, %c0_28] : memref<32x1xf32, #tpu.memory_space<vmem>>, vector<32x1xf32>
    %42 = vector.broadcast %41 : vector<32x1xf32> to vector<32x128xf32>
    %43 = arith.mulf %42, %40 : vector<32x128xf32>
    %cst_29 = arith.constant dense<0.000000e+00> : vector<128xf32>
    %44 = vector.multi_reduction <add>, %43, %cst_29 [0] : vector<32x128xf32> to vector<128xf32>
    %45 = vector.shape_cast %44 : vector<128xf32> to vector<1x128xf32>
    %c0_30 = arith.constant 0 : index
    %c0_31 = arith.constant 0 : index
    %46 = vector.load %arg8[%c0_30, %c0_31] : memref<1x1xf32, #tpu.memory_space<vmem>>, vector<1x1xf32>
    %47 = vector.broadcast %46 : vector<1x1xf32> to vector<1x128xf32>
    %48 = arith.addf %45, %47 : vector<1x128xf32>
    %cst_32 = arith.constant 0.000000e+00 : f32
    %49 = vector.broadcast %cst_32 : f32 to vector<1x128xf32>
    %50 = arith.subf %0, %49 : vector<1x128xf32>
    %cst_33 = arith.constant 1.000000e+00 : f32
    %51 = vector.broadcast %cst_33 : f32 to vector<1x128xf32>
    %52 = arith.subf %51, %0 : vector<1x128xf32>
    %53 = arith.mulf %50, %52 : vector<1x128xf32>
    %cst_34 = arith.constant 0.000000e+00 : f32
    %54 = vector.broadcast %cst_34 : f32 to vector<1x128xf32>
    %55 = arith.subf %1, %54 : vector<1x128xf32>
    %56 = arith.mulf %53, %55 : vector<1x128xf32>
    %cst_35 = arith.constant 1.000000e+00 : f32
    %57 = vector.broadcast %cst_35 : f32 to vector<1x128xf32>
    %58 = arith.subf %57, %1 : vector<1x128xf32>
    %59 = arith.mulf %56, %58 : vector<1x128xf32>
    %60 = arith.mulf %59, %48 : vector<1x128xf32>
    %cst_36 = arith.constant 5.000000e-01 : f32
    %61 = vector.broadcast %cst_36 : f32 to vector<1x128xf32>
    %62 = arith.addf %60, %61 : vector<1x128xf32>
    %c0_37 = arith.constant 0 : index
    %c0_38 = arith.constant 0 : index
    %63 = vector.load %arg9[%c0_37, %c0_38] : memref<1x128xf32, #tpu.memory_space<vmem>>, vector<1x128xf32>
    tpu.vector_store %arg9[%c0_37, %c0_38], %62 {strides = array<i32>} : memref<1x128xf32, #tpu.memory_space<vmem>>, vector<1x128xf32>,
    return
  }
  func.func @transform_0(%arg0: i32) -> (i32, i32) {
    %c0_i32 = arith.constant 0 : i32
    %c0_i32_0 = arith.constant 0 : i32
    return %c0_i32, %arg0 : i32, i32
  }
  func.func @transform_1(%arg0: i32) -> (i32, i32) {
    %c0_i32 = arith.constant 0 : i32
    %c0_i32_0 = arith.constant 0 : i32
    %c0_i32_1 = arith.constant 0 : i32
    return %c0_i32, %c0_i32_0 : i32, i32
  }
  func.func @transform_2(%arg0: i32) -> (i32, i32) {
    %c0_i32 = arith.constant 0 : i32
    %c0_i32_0 = arith.constant 0 : i32
    %c0_i32_1 = arith.constant 0 : i32
    return %c0_i32, %c0_i32_0 : i32, i32
  }
  func.func @transform_3(%arg0: i32) -> (i32, i32) {
    %c0_i32 = arith.constant 0 : i32
    %c0_i32_0 = arith.constant 0 : i32
    %c0_i32_1 = arith.constant 0 : i32
    return %c0_i32, %c0_i32_0 : i32, i32
  }
  func.func @transform_4(%arg0: i32) -> (i32, i32, i32) {
    %c0_i32 = arith.constant 0 : i32
    %c0_i32_0 = arith.constant 0 : i32
    %c0_i32_1 = arith.constant 0 : i32
    %c0_i32_2 = arith.constant 0 : i32
    return %c0_i32, %c0_i32_0, %c0_i32_1 : i32, i32, i32
  }
  func.func @transform_5(%arg0: i32) -> (i32, i32, i32) {
    %c0_i32 = arith.constant 0 : i32
    %c0_i32_0 = arith.constant 0 : i32
    %c0_i32_1 = arith.constant 0 : i32
    %c0_i32_2 = arith.constant 0 : i32
    return %c0_i32, %c0_i32_0, %c0_i32_1 : i32, i32, i32
  }
  func.func @transform_6(%arg0: i32) -> (i32, i32) {
    %c0_i32 = arith.constant 0 : i32
    %c0_i32_0 = arith.constant 0 : i32
    %c0_i32_1 = arith.constant 0 : i32
    return %c0_i32, %c0_i32_0 : i32, i32
  }
  func.func @transform_7(%arg0: i32) -> (i32, i32) {
    %c0_i32 = arith.constant 0 : i32
    %c0_i32_0 = arith.constant 0 : i32
    %c0_i32_1 = arith.constant 0 : i32
    return %c0_i32, %c0_i32_0 : i32, i32
  }
  func.func @transform_8(%arg0: i32) -> (i32, i32) {
    %c0_i32 = arith.constant 0 : i32
    %c0_i32_0 = arith.constant 0 : i32
    return %c0_i32, %arg0 : i32, i32
  }
}

</mosaic_0001>

<bundles_post_ra>
// kernel: tpu_custom_call.1
= control target key start
LH: loop header
LB: loop body
LE: loop exit
PB: predicated region body
PF: predicated region fallthrough
CT: control target
= control target key end

     0   :  { %s1308_s0 = inlined_call_operand.vmem [shape: f32[2,384], index: 0, kind: input, shape index: {}]   ;;  %s1309_s1 = inlined_call_operand.vmem [shape: f32[32,1], index: 1, kind: input, shape index: {}]   ;;  %s1310_s2 = inlined_call_operand.vmem [shape: f32[32,1], index: 2, kind: input, shape index: {}]   ;;  %s1311_s3 = inlined_call_operand.vmem [shape: f32[32,1], index: 3, kind: input, shape index: {}]   ;;  %s1312_s4 = inlined_call_operand.vmem [shape: bf16[3,32,32], index: 4, kind: input, shape index: {}]   ;;  %s1313_s5 = inlined_call_operand.vmem [shape: f32[3,32,1], index: 5, kind: input, shape index: {}]   ;;  %s1314_s6 = inlined_call_operand.vmem [shape: f32[32,1], index: 6, kind: input, shape index: {}]   ;;  %s1315_s7 = inlined_call_operand.<no memory space> [shape: f32[1,1], index: 7, kind: input, shape index: {}]   ;;  %s1316_s8 = inlined_call_operand.hbm [shape: f32[1,384], index: 8, kind: output, shape index: {}]  }
   0x1   :  { %v13_v0 = vstv %s1315_s7 }
   0x2   :  { %14 = vst [vmem:[#allocation2] sm:$0x1] %v13_v0 }
   0x3   :  { %15 = vsyncpa [#allocation4], 0 }
   0x4   :  { %17 = vsyncpa [#allocation4 + $0x1], 0  ;;  %s1085_s29 = smov 0   ;;  %s1087_s30 = smov 0  }
   0x5   :  { %s1089_s9 = smov 0   ;;  %s1091_s10 = smov 0  }
   0x6 LB: > { %s1106_s7 = sadd.s32 4294967295, %s1033_s10   ;;  %s827_s11 = sadd.s32 4294967294, %s1033_s10   ;;  %s1033_s10 = sphi %s1091_s10, %s1322_s10   ;;  %s1029_s9 = sphi %s1089_s9, %s1321_s9   ;;  %s1025_s30 = sphi %s1087_s30, %s1320_s30   ;;  %s1021_s29 = sphi %s1085_s29, %s1319_s29  }
   0x7   : > { %s1110_s12 = sadd.s32 1, %s1033_s10   ;;  %s203_s13 = sadd.s32 1, %s1029_s9 }
   0x8   : > { %s200_s14 = ssub.s32 %s1033_s10, %s1110_s12  ;;  %p213_p0 = scmp.ne.s32.totalorder %s1029_s9, %s1025_s30 }
   0x9   : > { %p201_p1 = scmp.eq.s32.totalorder %s200_s14, 0  ;;  %p214_p2 = scmp.eq.s32.totalorder %s1106_s7, 2 }
   0xa   : > { %p219_p3 = scmp.ne.s32.totalorder %s1025_s30, %s1021_s29  ;;  %p220_p4 = scmp.eq.s32.totalorder %s827_s11, 2 }
   0xb   : > { %s1121_s15 = scalar_select %p201_p1, %s1029_s9, %s203_s13  }
   0xc   : > { %p1123_p5 = por %p214_p2, %p213_p0  ;;  %p1127_p6 = por %p220_p4, %p219_p3 }
   0xd   : > { %p830_p7 = scmp.ge.s32.totalorder %s1033_s10, 1  ;;  %p266_p8 = scmp.lt.s32.totalorder %s1033_s10, 4 }
   0xf   : > { %p267_p9 = pnand %p830_p7, %p266_p8 }
  0x10   : > { %v337_v1 = vld [vmem:[%s1310_s2] sm:$0xff] (!%p267_p9)  ;;  %v1035_v3 = vmov (!%p267_p9), 0   ;;  %v338_v4 = vld [vmem:[%s1310_s2 + $0x8] sm:$0xff] (!%p267_p9)  ;;  %v308_v6 = vld [vmem:[%s1309_s1 + $0x18] sm:$0xff] (!%p267_p9)  ;;  %vm441_vm0 = vcmask (!%p267_p9), 261120   ;;  %p298_p10 = scmp.lt.s32.totalorder (!%p267_p9), %s1106_s7, 2  ;;  %v329_v32 = vlaneseq (!%p267_p9) }
  0x11   : > { %270 = sbr.rel (%p267_p9) target bundleno = 918 (0x396), region = 52  ;;  %v305_v2 = vld [vmem:[%s1309_s1] sm:$0xff] (!%p267_p9)  ;;  %940 = vset.pattern.permute.xlu1 (!%p267_p9), %v1035_v3  ;;  %939 = vset.pattern.permute.xlu0 (!%p267_p9), %v1035_v3  ;;  %v306_v5 = vld [vmem:[%s1309_s1 + $0x8] sm:$0xff] (!%p267_p9)  ;;  %v307_v7 = vld [vmem:[%s1309_s1 + $0x10] sm:$0xff] (!%p267_p9)  ;;  %s860_s22 = sshll.u32 (!%p267_p9), %s1106_s7, 4 }
  0x12   : > { %343 = vperm.xlu1 (!%p267_p9), %940, %v337_v1   ;;  %311 = vperm.xlu0 (!%p267_p9), %939, %v305_v2   ;;  %v340_v8 = vld [vmem:[%s1310_s2 + $0x18] sm:$0xff] (!%p267_p9)  ;;  %v339_v9 = vld [vmem:[%s1310_s2 + $0x10] sm:$0xff] (!%p267_p9)  ;;  %v374_v10 = vld [vmem:[%s1311_s3 + $0x8] sm:$0xff] (!%p267_p9)  ;;  %v330_v33 = vshrl.u32 (!%p267_p9), %v329_v32, 7  ;;  %s1266_s27 = scalar_lea.hbm (!%p267_p9), %s1316_s8, %s860_s22 }
  0x13   : > { %v373_v11 = vld [vmem:[%s1311_s3] sm:$0xff] (!%p267_p9)  ;;  %v376_v12 = vld [vmem:[%s1311_s3 + $0x18] sm:$0xff] (!%p267_p9)  ;;  %v375_v13 = vld [vmem:[%s1311_s3 + $0x10] sm:$0xff] (!%p267_p9) }
  0x14   : > { %v408_v14 = vld [vmem:[%s1313_s5 + $0x8] sm:$0xff] (!%p267_p9)  ;;  %v407_v15 = vld [vmem:[%s1313_s5] sm:$0xff] (!%p267_p9)  ;;  %v410_v16 = vld [vmem:[%s1313_s5 + $0x18] sm:$0xff] (!%p267_p9)  ;;  %v1226_v36 = vsub.s32 (!%p267_p9), 0, %v330_v33 }
  0x15   : > { %v409_v17 = vld [vmem:[%s1313_s5 + $0x10] sm:$0xff] (!%p267_p9)  ;;  %v941_v18 = vld [vmem:[%s1312_s4] sm:$0xff] (!%p267_p9)   ;;  %v841_v19 = vld [vmem:[%s1313_s5 + $0x28] sm:$0xff] (!%p267_p9) }
  0x16   : > { %348 = vperm.xlu1 (!%p267_p9), %940, %v338_v4   ;;  %316 = vperm.xlu0 (!%p267_p9), %939, %v306_v5   ;;  %v840_v20 = vld [vmem:[%s1313_s5 + $0x20] sm:$0xff] (!%p267_p9)  ;;  %v843_v21 = vld [vmem:[%s1313_s5 + $0x38] sm:$0xff] (!%p267_p9)  ;;  %v842_v22 = vld [vmem:[%s1313_s5 + $0x30] sm:$0xff] (!%p267_p9) }
  0x17   : > { %879 = vmatprep.mubr.msk.bf16.mxu0 (!%p267_p9), %vm441_vm0, %v941_v18  ;;  %v853_v23 = vld [vmem:[%s1313_s5 + $0x48] sm:$0xff] (!%p267_p9)  ;;  %v852_v24 = vld [vmem:[%s1313_s5 + $0x40] sm:$0xff] (!%p267_p9)  ;;  %v855_v25 = vld [vmem:[%s1313_s5 + $0x58] sm:$0xff] (!%p267_p9) }
  0x18   : > { %v854_v26 = vld [vmem:[%s1313_s5 + $0x50] sm:$0xff]  ;;  %v704_v27 = vld [vmem:[%s1314_s6 + $0x8] sm:$0xff]  ;;  %v703_v28 = vld [vmem:[%s1314_s6] sm:$0xff]  ;;  %s299_s20 = scalar_select %p298_p10, %s1106_s7, 2 }
  0x19   : > { %v706_v29 = vld [vmem:[%s1314_s6 + $0x18] sm:$0xff]  ;;  %v705_v30 = vld [vmem:[%s1314_s6 + $0x10] sm:$0xff]  ;;  %v740_v31 = vld [vmem:[#allocation2] sm:$0x1]  ;;  %s1036_s7 = smov [#allocation3]  }
  0x1a   : > { %326 = vperm.xlu1 %940, %v308_v6   ;;  %321 = vperm.xlu0 %939, %v307_v7   ;;  %s831_s21 = sshll.u32 %s299_s20, 1  ;;  %v942_v5 = vld [vmem:[%s1312_s4 + $0x8] sm:$0xff]   ;;  %v943_v6 = vld [vmem:[%s1312_s4 + $0x10] sm:$0xff]   ;;  %s975_s13 = sshll.u32 %s1036_s7, 4  ;;  %s976_s13 = int_to_ptr.vmem [resolvable:$false] %s975_s13 }
  0x1b   : > { %s301_s24 = scalar_lea.vmem %s1308_s0, %s831_s21  ;;  %887 = vmatprep.mubr.msk.bf16.mxu1 %vm441_vm0, %v943_v6  ;;  %s296_s21 = sand.u32 1, %s1025_s30  }
  0x1c   : > { %v1228_v37 = vld [vmem:[%s301_s24 + $0x1] sm:$0x1]  ;;  %v1230_v38 = vld [vmem:[%s301_s24] sm:$0x1]  ;;  %s297_s23 = scalar_lea.vmem [#allocation3], %s296_s21  ;;  %s760_s28 = scalar_lea.sflag [#allocation4], %s296_s21 }
  0x1d   : > { %v364_v41 = vrot.slane %v1228_v37, %v1226_v36  ;;  %v332_v42 = vrot.slane %v1230_v38, %v1226_v36  ;;  %s772_s24 = sshll.u32 %s297_s23, 4  ;;  %s977_s14 = scalar_lea.vmem %s976_s13, 32  ;;  %s1268_s24 = int_to_ptr.vmem [resolvable:$true] %s772_s24 }
  0x1e   : > { %358 = vperm.xlu1 %940, %v340_v8   ;;  %353 = vperm.xlu0 %939, %v339_v9   ;;  %s971_s11 = scalar_lea.vmem %s1268_s24, 16  ;;  %p978_p0 = scmp.lt.s32.totalorder %s1268_s24, %s976_s13 }
  0x1f   : > { %p972_p11 = scmp.ne.s32.totalorder %s1268_s24, %s971_s11  ;;  %p979_p1 = scmp.lt.s32.totalorder %s977_s14, %s971_s11 }
  0x21   : > { %p973_p12 = pnand %p972_p11, %p1123_p5  ;;  %p980_p2 = por %p979_p1, %p978_p0 }
  0x22   : > { %384 = vperm.xlu1 %940, %v374_v10   ;;  %379 = vperm.xlu0 %939, %v373_v11  }
  0x23   : > { %p974_p13 = pneg %p973_p12 }
  0x25   : > { %p981_p3 = pnand %p980_p2, %p974_p13 }
  0x26   : > { %394 = vperm.xlu1 %940, %v376_v12   ;;  %389 = vperm.xlu0 %939, %v375_v13  }
  0x2a   : > { %418 = vperm.xlu1 %940, %v408_v14   ;;  %413 = vperm.xlu0 %939, %v407_v15  }
  0x2e   : > { %428 = vperm.xlu1 %940, %v410_v16   ;;  %423 = vperm.xlu0 %939, %v409_v17  }
  0x32   : > { %520 = vperm.xlu1 %940, %v841_v19   ;;  %515 = vperm.xlu0 %939, %v840_v20  }
  0x36   : > { %530 = vperm.xlu1 %940, %v843_v21   ;;  %525 = vperm.xlu0 %939, %v842_v22  }
  0x3a   : > { %621 = vperm.xlu1 %940, %v853_v23   ;;  %616 = vperm.xlu0 %939, %v852_v24  }
  0x3e   : > { %631 = vperm.xlu1 %940, %v855_v25   ;;  %626 = vperm.xlu0 %939, %v854_v26   ;;  %v944_v25 = vld [vmem:[%s1312_s4 + $0x18] sm:$0xff]   ;;  %v945_v26 = vld [vmem:[%s1312_s4 + $0x20] sm:$0xff]  }
  0x42   : > { %714 = vperm.xlu1 %940, %v704_v27   ;;  %709 = vperm.xlu0 %939, %v703_v28  }
  0x46   : > { %724 = vperm.xlu1 %940, %v706_v29   ;;  %719 = vperm.xlu0 %939, %v705_v30  }
  0x4a   : > { %743 = vperm.xlu0 %939, %v740_v31  }
  0x91   : > { %v344_v34 = vpop.permute.xlu1 %343  ;;  %v312_v35 = vpop.permute.xlu0 %311 }
  0x92   : > { %v365_v45 = vmul.f32 %v364_v41, %v344_v34  ;;  %v333_v46 = vmul.f32 %v332_v42, %v312_v35 }
  0x94   : > { %v369_v54 = vadd.f32 %v365_v45, %v333_v46 }
  0x95   : > { %v349_v39 = vpop.permute.xlu1 %348  ;;  %v317_v40 = vpop.permute.xlu0 %316 }
  0x96   : > { %v366_v47 = vmul.f32 %v364_v41, %v349_v39  ;;  %v334_v48 = vmul.f32 %v332_v42, %v317_v40 }
  0x98   : > { %v370_v53 = vadd.f32 %v366_v47, %v334_v48  ;;  %v946_v48 = vld [vmem:[%s1312_s4 + $0x28] sm:$0xff]  }
  0x99   : > { %v327_v43 = vpop.permute.xlu1 %326  ;;  %v322_v44 = vpop.permute.xlu0 %321 }
  0x9a   : > { %v336_v57 = vmul.f32 %v332_v42, %v327_v43  ;;  %v335_v58 = vmul.f32 %v332_v42, %v322_v44 }
  0x9d   : > { %v359_v49 = vpop.permute.xlu1 %358  ;;  %v354_v50 = vpop.permute.xlu0 %353 }
  0x9e   : > { %v368_v51 = vmul.f32 %v364_v41, %v359_v49  ;;  %v367_v52 = vmul.f32 %v364_v41, %v354_v50 }
  0xa0   : > { %v372_v61 = vadd.f32 %v368_v51, %v336_v57  ;;  %v371_v62 = vadd.f32 %v367_v52, %v335_v58 }
  0xa1   : > { %v385_v55 = vpop.permute.xlu1 %384  ;;  %v380_v56 = vpop.permute.xlu0 %379 }
  0xa2   : > { %v398_v59 = vadd.f32 %v385_v55, %v370_v53  ;;  %v397_v60 = vadd.f32 %v380_v56, %v369_v54 }
  0xa4   : > { %v405_v63 = vpack.c.bf16 %v398_v59, %v397_v60 }
  0xa5   : > { %v395_v0 = vpop.permute.xlu1 %394  ;;  %v390_v1 = vpop.permute.xlu0 %389 }
  0xa6   : > { %v400_v2 = vadd.f32 %v395_v0, %v372_v61  ;;  %v399_v3 = vadd.f32 %v390_v1, %v371_v62  ;;  %875 = vmatprep.subr.bf16.mxu0 %v405_v63 }
  0xa7   : > { %876 = vmatpush3.bf16.msra.mxu0 %v405_v63 }
  0xa8   : > { %v406_v4 = vpack.c.bf16 %v400_v2, %v399_v3 }
  0xa9   : > { %v414_v7 = vpop.permute.xlu0 %413  ;;  %v419_v8 = vpop.permute.xlu1 %418 }
  0xaa   : > { %877 = vmatprep.subr.bf16.mxu0 %v406_v4 }
  0xab   : > { %878 = vmatpush3.bf16.msra.mxu0 %v406_v4 }
  0xad   : > { %v424_v9 = vpop.permute.xlu0 %423  ;;  %v429_v13 = vpop.permute.xlu1 %428 }
  0xae   : > { %880 = vmatmul.mubr.msk.bf16.vlgmr.msra.gmra.mrb[0].mxu0 %vm441_vm0, %v942_v5 }
  0xaf   : > { %895 = vmatprep.mubr.msk.bf16.mxu0 %vm441_vm0, %v945_v26 }
  0xb1   : > { %v516_v27 = vpop.permute.xlu0 %515  ;;  %v521_v28 = vpop.permute.xlu1 %520 }
  0xb5   : > { %v526_v29 = vpop.permute.xlu0 %525  ;;  %v531_v33 = vpop.permute.xlu1 %530 }
  0xb9   : > { %v617_v49 = vpop.permute.xlu0 %616  ;;  %v622_v50 = vpop.permute.xlu1 %621 }
  0xbd   : > { %v627_v51 = vpop.permute.xlu0 %626  ;;  %v632_v57 = vpop.permute.xlu1 %631 }
  0xc1   : > { %v710_v61 = vpop.permute.xlu0 %709  ;;  %v715_v63 = vpop.permute.xlu1 %714 }
  0xc5   : > { %v720_v5 = vpop.permute.xlu0 %719 }
 0x181   : > { %v881_v10 = vpop.f32.mrb[0].mxu0 }
 0x182   : > { %v491_v11 = vadd.f32 %v881_v10, %v424_v9  ;;  %v482_v12 = vpop.f32.mrb[1].mxu0 }
 0x183   : > { %v483_v14 = vadd.f32 %v482_v12, %v414_v7  ;;  %v882_v15 = vpop.f32.mrb[2].mxu0 }
 0x184   : > { %947 = vtanh.f32 %v491_v11  ;;  %v494_v16 = vadd.f32 %v882_v15, %v429_v13  ;;  %v485_v17 = vpop.f32.mrb[3].mxu0  ;;  %v751_v11 = vsub.f32 1.0, %v1230_v38 }
 0x185   : > { %949 = vtanh.f32 %v483_v14  ;;  %v486_v18 = vadd.f32 %v485_v17, %v419_v8  ;;  %v725_v8 = vpop.permute.xlu1 %724 }
 0x186   : > { %951 = vtanh.f32 %v494_v16  ;;  %v752_v15 = vmul.f32 %v751_v11, %v1230_v38 }
 0x187   : > { %953 = vtanh.f32 %v486_v18 }
 0x188   : > { %v753_v18 = vmul.f32 %v752_v15, %v1228_v37 }
 0x18e   : > { %v948_v19 = vpop.eup %947 }
 0x18f   : > { %v950_v20 = vpop.eup %949 }
 0x190   : > { %v952_v21 = vpop.eup %951 }
 0x191   : > { %v954_v22 = vpop.eup %953  ;;  %v507_v23 = vpack.c.bf16 %v952_v21, %v948_v19  ;;  %v754_v19 = vsub.f32 1.0, %v1228_v37 }
 0x192   : > { %v506_v24 = vpack.c.bf16 %v954_v22, %v950_v20  ;;  %v744_v20 = vpop.permute.xlu0 %743 }
 0x193   : > { %v749_v22 = vrot.slane %v744_v20, %v1226_v36 }
 0x194   : > { %883 = vmatprep.subr.bf16.mxu1 %v506_v24 }
 0x195   : > { %884 = vmatpush3.bf16.msra.mxu1 %v506_v24  ;;  %v755_v24 = vmul.f32 %v754_v19, %v753_v18 }
 0x196   : > { %885 = vmatprep.subr.bf16.mxu1 %v507_v23 }
 0x199   : > { %886 = vmatpush3.bf16.msra.mxu1 %v507_v23 }
 0x19c   : > { %888 = vmatmul.mubr.msk.bf16.vlgmr.msra.gmra.mrb[0].mxu1 %vm441_vm0, %v944_v25 }
 0x26f   : > { %v889_v30 = vpop.f32.mrb[0].mxu1 }
 0x270   : > { %v592_v31 = vadd.f32 %v889_v30, %v526_v29  ;;  %v583_v32 = vpop.f32.mrb[1].mxu1 }
 0x271   : > { %v584_v34 = vadd.f32 %v583_v32, %v516_v27  ;;  %v890_v35 = vpop.f32.mrb[2].mxu1 }
 0x272   : > { %955 = vtanh.f32 %v592_v31  ;;  %v595_v39 = vadd.f32 %v890_v35, %v531_v33  ;;  %v586_v40 = vpop.f32.mrb[3].mxu1 }
 0x273   : > { %957 = vtanh.f32 %v584_v34  ;;  %v587_v41 = vadd.f32 %v586_v40, %v521_v28 }
 0x274   : > { %959 = vtanh.f32 %v595_v39 }
 0x275   : > { %961 = vtanh.f32 %v587_v41 }
 0x27c   : > { %v956_v42 = vpop.eup %955 }
 0x27d   : > { %v958_v43 = vpop.eup %957 }
 0x27e   : > { %v960_v44 = vpop.eup %959 }
 0x27f   : > { %v962_v45 = vpop.eup %961  ;;  %v608_v46 = vpack.c.bf16 %v960_v44, %v956_v42 }
 0x280   : > { %v607_v47 = vpack.c.bf16 %v962_v45, %v958_v43 }
 0x282   : > { %891 = vmatprep.subr.bf16.mxu0 %v607_v47 }
 0x283   : > { %892 = vmatpush3.bf16.msra.mxu0 %v607_v47 }
 0x284   : > { %893 = vmatprep.subr.bf16.mxu0 %v608_v46 }
 0x287   : > { %894 = vmatpush3.bf16.msra.mxu0 %v608_v46 }
 0x28a   : > { %896 = vmatmul.mubr.msk.bf16.vlgmr.msra.gmra.mrb[4].mxu0 %vm441_vm0, %v946_v48 }
 0x35d   : > { %v897_v52 = vpop.f32.mrb[4].mxu0 }
 0x35e   : > { %v693_v53 = vadd.f32 %v897_v52, %v627_v51  ;;  %v684_v54 = vpop.f32.mrb[5].mxu0 }
 0x35f   : > { %v685_v55 = vadd.f32 %v684_v54, %v617_v49  ;;  %v898_v56 = vpop.f32.mrb[6].mxu0 }
 0x360   : > { %v687_v58 = vpop.f32.mrb[7].mxu0  ;;  %v696_v59 = vadd.f32 %v898_v56, %v632_v57 }
 0x361   : > { %963 = vtanh.f32 %v685_v55  ;;  %v688_v60 = vadd.f32 %v687_v58, %v622_v50 }
 0x362   : > { %965 = vtanh.f32 %v693_v53 }
 0x363   : > { %967 = vtanh.f32 %v688_v60 }
 0x364   : > { %969 = vtanh.f32 %v696_v59 }
 0x36b   : > { %v964_v62 = vpop.eup %963 }
 0x36c   : > { %v966_v0 = vpop.eup %965  ;;  %v727_v2 = vmul.f32 %v964_v62, %v710_v61 }
 0x36d   : > { %v968_v1 = vpop.eup %967  ;;  %v729_v6 = vmul.f32 %v966_v0, %v720_v5 }
 0x36e   : > { %v728_v3 = vmul.f32 %v968_v1, %v715_v63  ;;  %v970_v4 = vpop.eup %969 }
 0x36f   : > { %v730_v9 = vmul.f32 %v970_v4, %v725_v8 }
 0x370   : > { %v731_v7 = vadd.f32 %v728_v3, %v727_v2 }
 0x372   : > { %v732_v10 = vadd.f32 %v731_v7, %v729_v6 }
 0x374   : > { %v733_v12 = vadd.f32 %v732_v10, %v730_v9 }
 0x376   : > { %v734_v13 = vrot.slane %v733_v12, 4 }
 0x378   : > { %v735_v14 = vadd.f32 %v734_v13, %v733_v12 }
 0x37a   : > { %v736_v16 = vrot.slane %v735_v14, 2 }
 0x37c   : > { %v737_v17 = vadd.f32 %v736_v16, %v735_v14 }
 0x37e   : > { %v738_v21 = vrot.slane %v737_v17, 1 }
 0x380   : > { %v739_v23 = vadd.f32 %v738_v21, %v737_v17 }
 0x382   : > { %v750_v25 = vadd.f32 %v749_v22, %v739_v23 }
 0x384   : > { %v756_v26 = vmul.f32 %v755_v24, %v750_v25 }
 0x386   : > { %v757_v38 = vadd.f32 0.5, %v756_v26 }
 0x388   : > { %758 = vst [vmem:[%s297_s23] sm:$0x1] %v757_v38 }
 0x389   : > { %984 = shalt.err (!%p981_p3)
}
 0x38a   : > { %s985_s18 = scalar_lea.hbm %s1266_s27, 16  ;;  %s989_s21 = scalar_lea.hbm %s1316_s8, 48 }
 0x38b   : > { %p986_p4 = scmp.ne.s32.totalorder %s1266_s27, %s985_s18  ;;  %p990_p9 = scmp.lt.u32.totalorder %s1266_s27, %s1316_s8 }
 0x38c   : > { %p991_p10 = scmp.lt.u32.totalorder %s989_s21, %s985_s18  ;;  %p993_p12 = scmp.lt.u32.totalorder %s985_s18, %s1266_s27 }
 0x38d   : > { %p987_p7 = pnand %p986_p4, %p1123_p5 }
 0x38e   : > { %p992_p11 = por %p991_p10, %p990_p9 }
 0x38f   : > { %p988_p8 = pneg %p987_p7 }
 0x390   : > { %p994_p13 = por %p993_p12, %p992_p11 }
 0x392   : > { %p995_p0 = pnand %p994_p13, %p988_p8 }
 0x394   : > { %998 = shalt.err (!%p995_p0)
}
 0x395   : > { %899 = dma.vmem_to_hbm [thread:$0]  (%p1123_p5), %s1268_s24, 16, %s1266_s27, %s760_s28  }
 0x396 PF: > { %p905_p1 = scmp.ge.s32.totalorder %s1033_s10, 2  ;;  %s784_s25 = sand.u32 1, %s1021_s29  }
 0x397   : > { %s785_s26 = scalar_lea.sflag [#allocation4], %s784_s25 }
 0x398   : > { %p902_p2 = pnand %p905_p1, %p1127_p6 }
 0x39a   : > { %1016 = dma.done.wait (!%p902_p2), %s785_s26, 16  }
 0x39b   : > { %1018 = vsyncadd (!%p902_p2), %s785_s26, 4294967280  ;;  %p20_p3 = scmp.ge.s32.totalorder %s1110_s12, 5   ;;  %s1319_s29 = smov %s1025_s30 }
 0x39c   : > { %s1320_s30 = smov %s1029_s9  ;;  %s1321_s9 = smov %s1121_s15 }
 0x39d   : > { %s1322_s10 = smov %s1110_s12  ;;  %22 = sbr.rel (!%p20_p3) target bundleno = 6 (0x6), region = 91 }
 0x3a4   :  { %789 = vsyncpa [#allocation4], 1 }
 0x3a5   :  { %791 = vsyncpa [#allocation4 + $0x1], 1 }

</bundles_post_ra>
